<compile_context>
chip_gen: v5e
topology: v5e:2x2
jax: 0.10.0
libtpu: 0.0.40
codegen_flags: <defaults>
</compile_context>

<pallas_src>
import functools

import jax
import jax.numpy as jnp
from jax.experimental import pallas as pl
from jax.experimental.pallas import tpu as pltpu

LANE = 128
MAX_TILE_ROWS = 2048  # 1 MiB f32 input tile; 2 inputs x 2 bufs = 4 MiB VMEM (safe on v5e/v6e/v7x)


def _soft_f1_kernel(pred_ref, tgt_ref, tp_ref, sp_ref, st_ref, *,
                    n_valid, n_full_blocks, inner_steps, tile_rows):
    """Accumulates lane-dense partial sums of (t*sigmoid(p)), sigmoid(p), t."""
    par = pl.program_id(0)
    inner = pl.program_id(1)
    blk = par * inner_steps + inner  # logical row-block index

    # Reset per-parallel-slice partial sums at the start of the reduction axis.
    @pl.when(inner == 0)
    def _():
        tp_ref[...] = jnp.zeros_like(tp_ref)
        sp_ref[...] = jnp.zeros_like(sp_ref)
        st_ref[...] = jnp.zeros_like(st_ref)

    p = jax.nn.sigmoid(pred_ref[...].astype(jnp.float32))
    t = tgt_ref[...].astype(jnp.float32)

    grp = tile_rows // 8  # tile_rows is always a multiple of 8

    def accumulate(p_v, t_v):
        # (tile_rows, 128) -> (grp, 8, 128) keeps (8,128) vreg tiles intact; the
        # axis-0 reduce is cheap VPU adds, hidden under the HBM roofline.
        tp_ref[...] += jnp.sum((t_v * p_v).reshape(grp, 8, LANE), axis=0)
        sp_ref[...] += jnp.sum(p_v.reshape(grp, 8, LANE), axis=0)
        st_ref[...] += jnp.sum(t_v.reshape(grp, 8, LANE), axis=0)

    # Fast path: block is entirely inside the valid range -> no masking needed.
    @pl.when(blk < n_full_blocks)
    def _():
        accumulate(p, t)

    # Tail / clamped-duplicate path: mask out elements with index >= n_valid.
    @pl.when(blk >= n_full_blocks)
    def _():
        row0 = blk * tile_rows
        rows = jax.lax.broadcasted_iota(jnp.int32, (tile_rows, LANE), 0) + row0
        lanes = jax.lax.broadcasted_iota(jnp.int32, (tile_rows, LANE), 1)
        mask = rows * LANE + lanes < n_valid
        accumulate(jnp.where(mask, p, 0.0), jnp.where(mask, t, 0.0))


def soft_f1_loss_with_logits(pred, target, *, max_tile_rows=MAX_TILE_ROWS, n_par=2):
    """Pallas implementation of SoftF1LossWithLogits.forward. Returns an f32 scalar."""
    assert pred.shape == target.shape

    pred_flat = pred.reshape(-1)
    tgt_flat = target.reshape(-1)
    n = pred_flat.shape[0]

    # Only pad up to the next (8*128)-element boundary so the 2-D reshape is legal.
    # Pad values are irrelevant (masked in-kernel); for typical dense-prediction
    # shapes this branch is skipped entirely (no extra HBM pass).
    pad = (-n) % (8 * LANE)
    if pad:
        pred_flat = jnp.concatenate(
            [pred_flat, jnp.zeros((pad,), dtype=pred_flat.dtype)])
        tgt_flat = jnp.concatenate(
            [tgt_flat, jnp.zeros((pad,), dtype=tgt_flat.dtype)])

    m = pred_flat.shape[0] // LANE          # multiple of 8
    pred2d = pred_flat.reshape(m, LANE)      # native dtype, no f32 upcast here
    tgt2d = tgt_flat.reshape(m, LANE)

    tile_rows = min(max_tile_rows, m)        # multiple of 8 by construction
    total_blocks = (m + tile_rows - 1) // tile_rows
    n_par = min(n_par, total_blocks)
    inner_steps = (total_blocks + n_par - 1) // n_par
    n_full_blocks = n // (tile_rows * LANE)  # blocks with no invalid elements
    last_blk = total_blocks - 1

    kernel = functools.partial(
        _soft_f1_kernel,
        n_valid=n,
        n_full_blocks=n_full_blocks,
        inner_steps=inner_steps,
        tile_rows=tile_rows,
    )

    def in_map(par, inner):
        # Clamp so DMAs never start past the array; clamped duplicates are
        # zeroed by the in-kernel mask.
        return (jnp.minimum(par * inner_steps + inner, last_blk), 0)

    out_spec = pl.BlockSpec((None, 8, LANE), lambda par, inner: (par, 0, 0))
    part_shape = jax.ShapeDtypeStruct((n_par, 8, LANE), jnp.float32)

    tp_p, sp_p, st_p = pl.pallas_call(
        kernel,
        out_shape=(part_shape, part_shape, part_shape),
        grid_spec=pltpu.PrefetchScalarGridSpec(
            num_scalar_prefetch=0,
            grid=(n_par, inner_steps),
            in_specs=[
                pl.BlockSpec((tile_rows, LANE), in_map),
                pl.BlockSpec((tile_rows, LANE), in_map),
            ],
            out_specs=(out_spec, out_spec, out_spec),
        ),
        compiler_params=pltpu.CompilerParams(
            dimension_semantics=("parallel", "arbitrary"),
            vmem_limit_bytes=32 * 1024 * 1024,
        ),
    )(pred2d, tgt2d)

    # Tiny final reduction + F1 formula in plain JAX (runs once, off critical path).
    tp = jnp.sum(tp_p)
    sp = jnp.sum(sp_p)   # = tp + fp
    st = jnp.sum(st_p)   # = tp + fn
    fp = sp - tp
    fn = st - tp
    prec = tp / (tp + fp + 1e-16)
    rec = tp / (tp + fn + 1e-16)
    soft_f1 = 2.0 * prec * rec / (prec + rec + 1e-16)
    return (1.0 - soft_f1).astype(jnp.float32)


def _reference(pred, target):
    p = jax.nn.sigmoid(pred.astype(jnp.float32))
    t = target.astype(jnp.float32)
    tp = jnp.sum(t * p)
    fp = jnp.sum((1.0 - t) * p)
    fn = jnp.sum(t * (1.0 - p))
    prec = tp / (tp + fp + 1e-16)
    rec = tp / (tp + fn + 1e-16)
    soft_f1 = 2.0 * prec * rec / (prec + rec + 1e-16)
    return 1.0 - soft_f1


if __name__ == "__main__":
    key = jax.random.PRNGKey(0)
    k1, k2, k3, k4, k5, k6 = jax.random.split(key, 6)

    # 1) Main case: dense-prediction shape (batch=2, C=4, H=16, W=16), fast path.
    pred = jax.random.normal(k1, (2, 4, 16, 16), dtype=jnp.float32)
    target = jax.random.bernoulli(k2, 0.3, (2, 4, 16, 16)).astype(jnp.float32)
    loss = jax.block_until_ready(soft_f1_loss_with_logits(pred, target))
    ref = jax.block_until_ready(_reference(pred, target))
    assert jnp.allclose(loss, ref, atol=1e-5, rtol=1e-5), (loss, ref)

    # 2) Ragged case: exercises the in-kernel tail mask (n not a multiple of 1024).
    pred_r = jax.random.normal(k3, (3, 5, 7, 11), dtype=jnp.float32)
    target_r = jax.random.bernoulli(k4, 0.3, (3, 5, 7, 11)).astype(jnp.float32)
    loss_r = jax.block_until_ready(soft_f1_loss_with_logits(pred_r, target_r))
    ref_r = jax.block_until_ready(_reference(pred_r, target_r))
    assert jnp.allclose(loss_r, ref_r, atol=1e-5, rtol=1e-5), (loss_r, ref_r)

    # 3) Multi-block + 2-way parallel split (small tiles forced to exercise the
    #    2-D grid, block-index clamping and duplicate-block masking).
    pred_p = jax.random.normal(k5, (3, 4, 16, 16), dtype=jnp.float32)
    target_p = jax.random.bernoulli(k6, 0.3, (3, 4, 16, 16)).astype(jnp.float32)
    loss_p = jax.block_until_ready(
        soft_f1_loss_with_logits(pred_p, target_p, max_tile_rows=8))
    ref_p = jax.block_until_ready(_reference(pred_p, target_p))
    assert jnp.allclose(loss_p, ref_p, atol=1e-5, rtol=1e-5), (loss_p, ref_p)

    print("KERNEL_OK")
</pallas_src>

<mosaic_0001>
module attributes {stable_mosaic.version = 11 : i64} {
  func.func @_soft_f1_kernel(%arg0: i32, %arg1: i32, %arg2: memref<16x128xf32, #tpu.memory_space<vmem>>, %arg3: memref<16x128xf32, #tpu.memory_space<vmem>>, %arg4: memref<1x8x128xf32, #tpu.memory_space<vmem>>, %arg5: memref<1x8x128xf32, #tpu.memory_space<vmem>>, %arg6: memref<1x8x128xf32, #tpu.memory_space<vmem>>) attributes {dimension_semantics = [#tpu.dimension_semantics<parallel>, #tpu.dimension_semantics<arbitrary>], iteration_bounds = array<i64: 1, 1>, scalar_prefetch = 0 : i64, scratch_operands = 0 : i64, tpu.core_type = #tpu.core_type<tc>, window_params = [{transform_indices = @transform_0, window_bounds = array<i64: 16, 128>}, {transform_indices = @transform_1, window_bounds = array<i64: 16, 128>}, {transform_indices = @transform_2, window_bounds = array<i64: 1, 8, 128>}, {transform_indices = @transform_3, window_bounds = array<i64: 1, 8, 128>}, {transform_indices = @transform_4, window_bounds = array<i64: 1, 8, 128>}]} {
    %c1_i32 = arith.constant 1 : i32
    %0 = arith.muli %arg0, %c1_i32 : i32
    %1 = arith.addi %0, %arg1 : i32
    %c0_i32 = arith.constant 0 : i32
    %2 = arith.cmpi eq, %arg1, %c0_i32 : i32
    %3 = arith.extui %2 : i1 to i32
    %c0_i32_0 = arith.constant 0 : i32
    %4 = arith.cmpi ne, %3, %c0_i32_0 : i32
    scf.if %4 {
      %cst_8 = arith.constant 0.000000e+00 : f32
      %18 = vector.broadcast %cst_8 : f32 to vector<8x128xf32>
      %c0_9 = arith.constant 0 : index
      %c0_10 = arith.constant 0 : index
      %c0_11 = arith.constant 0 : index
      %19 = vector.load %arg4[%c0_9, %c0_10, %c0_11] : memref<1x8x128xf32, #tpu.memory_space<vmem>>, vector<1x8x128xf32>
      %20 = vector.shape_cast %19 : vector<1x8x128xf32> to vector<8x128xf32>
      %21 = vector.shape_cast %18 : vector<8x128xf32> to vector<1x8x128xf32>
      tpu.vector_store %arg4[%c0_9, %c0_10, %c0_11], %21 {strides = array<i32>} : memref<1x8x128xf32, #tpu.memory_space<vmem>>, vector<1x8x128xf32>,
      %cst_12 = arith.constant 0.000000e+00 : f32
      %22 = vector.broadcast %cst_12 : f32 to vector<8x128xf32>
      %c0_13 = arith.constant 0 : index
      %c0_14 = arith.constant 0 : index
      %c0_15 = arith.constant 0 : index
      %23 = vector.load %arg5[%c0_13, %c0_14, %c0_15] : memref<1x8x128xf32, #tpu.memory_space<vmem>>, vector<1x8x128xf32>
      %24 = vector.shape_cast %23 : vector<1x8x128xf32> to vector<8x128xf32>
      %25 = vector.shape_cast %22 : vector<8x128xf32> to vector<1x8x128xf32>
      tpu.vector_store %arg5[%c0_13, %c0_14, %c0_15], %25 {strides = array<i32>} : memref<1x8x128xf32, #tpu.memory_space<vmem>>, vector<1x8x128xf32>,
      %cst_16 = arith.constant 0.000000e+00 : f32
      %26 = vector.broadcast %cst_16 : f32 to vector<8x128xf32>
      %c0_17 = arith.constant 0 : index
      %c0_18 = arith.constant 0 : index
      %c0_19 = arith.constant 0 : index
      %27 = vector.load %arg6[%c0_17, %c0_18, %c0_19] : memref<1x8x128xf32, #tpu.memory_space<vmem>>, vector<1x8x128xf32>
      %28 = vector.shape_cast %27 : vector<1x8x128xf32> to vector<8x128xf32>
      %29 = vector.shape_cast %26 : vector<8x128xf32> to vector<1x8x128xf32>
      tpu.vector_store %arg6[%c0_17, %c0_18, %c0_19], %29 {strides = array<i32>} : memref<1x8x128xf32, #tpu.memory_space<vmem>>, vector<1x8x128xf32>,
    } else {
    }
    %c0 = arith.constant 0 : index
    %c0_1 = arith.constant 0 : index
    %5 = vector.load %arg2[%c0, %c0_1] : memref<16x128xf32, #tpu.memory_space<vmem>>, vector<16x128xf32>
    %6 = arith.negf %5 : vector<16x128xf32>
    %7 = math.exp %6 : vector<16x128xf32>
    %cst = arith.constant 1.000000e+00 : f32
    %8 = vector.broadcast %cst : f32 to vector<16x128xf32>
    %9 = arith.addf %8, %7 : vector<16x128xf32>
    %10 = arith.divf %8, %9 : vector<16x128xf32>
    %c0_2 = arith.constant 0 : index
    %c0_3 = arith.constant 0 : index
    %11 = vector.load %arg3[%c0_2, %c0_3] : memref<16x128xf32, #tpu.memory_space<vmem>>, vector<16x128xf32>
    %c1_i32_4 = arith.constant 1 : i32
    %12 = arith.cmpi slt, %1, %c1_i32_4 : i32
    %13 = arith.extui %12 : i1 to i32
    %c0_i32_5 = arith.constant 0 : i32
    %14 = arith.cmpi ne, %13, %c0_i32_5 : i32
    scf.if %14 {
      %c0_8 = arith.constant 0 : index
      %c0_9 = arith.constant 0 : index
      %c0_10 = arith.constant 0 : index
      %18 = vector.load %arg4[%c0_8, %c0_9, %c0_10] : memref<1x8x128xf32, #tpu.memory_space<vmem>>, vector<1x8x128xf32>
      %19 = vector.shape_cast %18 : vector<1x8x128xf32> to vector<8x128xf32>
      %20 = arith.mulf %11, %10 : vector<16x128xf32>
      %21 = vector.shape_cast %20 : vector<16x128xf32> to vector<2x8x128xf32>
      %cst_11 = arith.constant dense<0.000000e+00> : vector<8x128xf32>
      %22 = vector.multi_reduction <add>, %21, %cst_11 [0] : vector<2x8x128xf32> to vector<8x128xf32>
      %23 = arith.addf %19, %22 : vector<8x128xf32>
      %c0_12 = arith.constant 0 : index
      %c0_13 = arith.constant 0 : index
      %c0_14 = arith.constant 0 : index
      %24 = vector.load %arg4[%c0_12, %c0_13, %c0_14] : memref<1x8x128xf32, #tpu.memory_space<vmem>>, vector<1x8x128xf32>
      %25 = vector.shape_cast %24 : vector<1x8x128xf32> to vector<8x128xf32>
      %26 = vector.shape_cast %23 : vector<8x128xf32> to vector<1x8x128xf32>
      tpu.vector_store %arg4[%c0_12, %c0_13, %c0_14], %26 {strides = array<i32>} : memref<1x8x128xf32, #tpu.memory_space<vmem>>, vector<1x8x128xf32>,
      %c0_15 = arith.constant 0 : index
      %c0_16 = arith.constant 0 : index
      %c0_17 = arith.constant 0 : index
      %27 = vector.load %arg5[%c0_15, %c0_16, %c0_17] : memref<1x8x128xf32, #tpu.memory_space<vmem>>, vector<1x8x128xf32>
      %28 = vector.shape_cast %27 : vector<1x8x128xf32> to vector<8x128xf32>
      %29 = vector.shape_cast %10 : vector<16x128xf32> to vector<2x8x128xf32>
      %cst_18 = arith.constant dense<0.000000e+00> : vector<8x128xf32>
      %30 = vector.multi_reduction <add>, %29, %cst_18 [0] : vector<2x8x128xf32> to vector<8x128xf32>
      %31 = arith.addf %28, %30 : vector<8x128xf32>
      %c0_19 = arith.constant 0 : index
      %c0_20 = arith.constant 0 : index
      %c0_21 = arith.constant 0 : index
      %32 = vector.load %arg5[%c0_19, %c0_20, %c0_21] : memref<1x8x128xf32, #tpu.memory_space<vmem>>, vector<1x8x128xf32>
      %33 = vector.shape_cast %32 : vector<1x8x128xf32> to vector<8x128xf32>
      %34 = vector.shape_cast %31 : vector<8x128xf32> to vector<1x8x128xf32>
      tpu.vector_store %arg5[%c0_19, %c0_20, %c0_21], %34 {strides = array<i32>} : memref<1x8x128xf32, #tpu.memory_space<vmem>>, vector<1x8x128xf32>,
      %c0_22 = arith.constant 0 : index
      %c0_23 = arith.constant 0 : index
      %c0_24 = arith.constant 0 : index
      %35 = vector.load %arg6[%c0_22, %c0_23, %c0_24] : memref<1x8x128xf32, #tpu.memory_space<vmem>>, vector<1x8x128xf32>
      %36 = vector.shape_cast %35 : vector<1x8x128xf32> to vector<8x128xf32>
      %37 = vector.shape_cast %11 : vector<16x128xf32> to vector<2x8x128xf32>
      %cst_25 = arith.constant dense<0.000000e+00> : vector<8x128xf32>
      %38 = vector.multi_reduction <add>, %37, %cst_25 [0] : vector<2x8x128xf32> to vector<8x128xf32>
      %39 = arith.addf %36, %38 : vector<8x128xf32>
      %c0_26 = arith.constant 0 : index
      %c0_27 = arith.constant 0 : index
      %c0_28 = arith.constant 0 : index
      %40 = vector.load %arg6[%c0_26, %c0_27, %c0_28] : memref<1x8x128xf32, #tpu.memory_space<vmem>>, vector<1x8x128xf32>
      %41 = vector.shape_cast %40 : vector<1x8x128xf32> to vector<8x128xf32>
      %42 = vector.shape_cast %39 : vector<8x128xf32> to vector<1x8x128xf32>
      tpu.vector_store %arg6[%c0_26, %c0_27, %c0_28], %42 {strides = array<i32>} : memref<1x8x128xf32, #tpu.memory_space<vmem>>, vector<1x8x128xf32>,
    } else {
    }
    %c1_i32_6 = arith.constant 1 : i32
    %15 = arith.cmpi sge, %1, %c1_i32_6 : i32
    %16 = arith.extui %15 : i1 to i32
    %c0_i32_7 = arith.constant 0 : i32
    %17 = arith.cmpi ne, %16, %c0_i32_7 : i32
    scf.if %17 {
      %c16_i32 = arith.constant 16 : i32
      %18 = arith.muli %1, %c16_i32 : i32
      %19 = tpu.iota {dimensions = array<i32: 0>} : vector<16x128xi32>
      %20 = vector.broadcast %18 : i32 to vector<16x128xi32>
      %21 = arith.addi %19, %20 : vector<16x128xi32>
      %22 = tpu.iota {dimensions = array<i32: 1>} : vector<16x128xi32>
      %c128_i32 = arith.constant 128 : i32
      %23 = vector.broadcast %c128_i32 : i32 to vector<16x128xi32>
      %24 = arith.muli %21, %23 : vector<16x128xi32>
      %25 = arith.addi %24, %22 : vector<16x128xi32>
      %c2048_i32 = arith.constant 2048 : i32
      %26 = vector.broadcast %c2048_i32 : i32 to vector<16x128xi32>
      %27 = arith.cmpi slt, %25, %26 : vector<16x128xi32>
      %cst_8 = arith.constant 0.000000e+00 : f32
      %28 = vector.broadcast %cst_8 : f32 to vector<16x128xf32>
      %29 = arith.select %27, %10, %28 : vector<16x128xi1>, vector<16x128xf32>
      %cst_9 = arith.constant 0.000000e+00 : f32
      %30 = vector.broadcast %cst_9 : f32 to vector<16x128xf32>
      %31 = arith.select %27, %11, %30 : vector<16x128xi1>, vector<16x128xf32>
      %c0_10 = arith.constant 0 : index
      %c0_11 = arith.constant 0 : index
      %c0_12 = arith.constant 0 : index
      %32 = vector.load %arg4[%c0_10, %c0_11, %c0_12] : memref<1x8x128xf32, #tpu.memory_space<vmem>>, vector<1x8x128xf32>
      %33 = vector.shape_cast %32 : vector<1x8x128xf32> to vector<8x128xf32>
      %34 = arith.mulf %31, %29 : vector<16x128xf32>
      %35 = vector.shape_cast %34 : vector<16x128xf32> to vector<2x8x128xf32>
      %cst_13 = arith.constant dense<0.000000e+00> : vector<8x128xf32>
      %36 = vector.multi_reduction <add>, %35, %cst_13 [0] : vector<2x8x128xf32> to vector<8x128xf32>
      %37 = arith.addf %33, %36 : vector<8x128xf32>
      %c0_14 = arith.constant 0 : index
      %c0_15 = arith.constant 0 : index
      %c0_16 = arith.constant 0 : index
      %38 = vector.load %arg4[%c0_14, %c0_15, %c0_16] : memref<1x8x128xf32, #tpu.memory_space<vmem>>, vector<1x8x128xf32>
      %39 = vector.shape_cast %38 : vector<1x8x128xf32> to vector<8x128xf32>
      %40 = vector.shape_cast %37 : vector<8x128xf32> to vector<1x8x128xf32>
      tpu.vector_store %arg4[%c0_14, %c0_15, %c0_16], %40 {strides = array<i32>} : memref<1x8x128xf32, #tpu.memory_space<vmem>>, vector<1x8x128xf32>,
      %c0_17 = arith.constant 0 : index
      %c0_18 = arith.constant 0 : index
      %c0_19 = arith.constant 0 : index
      %41 = vector.load %arg5[%c0_17, %c0_18, %c0_19] : memref<1x8x128xf32, #tpu.memory_space<vmem>>, vector<1x8x128xf32>
      %42 = vector.shape_cast %41 : vector<1x8x128xf32> to vector<8x128xf32>
      %43 = vector.shape_cast %29 : vector<16x128xf32> to vector<2x8x128xf32>
      %cst_20 = arith.constant dense<0.000000e+00> : vector<8x128xf32>
      %44 = vector.multi_reduction <add>, %43, %cst_20 [0] : vector<2x8x128xf32> to vector<8x128xf32>
      %45 = arith.addf %42, %44 : vector<8x128xf32>
      %c0_21 = arith.constant 0 : index
      %c0_22 = arith.constant 0 : index
      %c0_23 = arith.constant 0 : index
      %46 = vector.load %arg5[%c0_21, %c0_22, %c0_23] : memref<1x8x128xf32, #tpu.memory_space<vmem>>, vector<1x8x128xf32>
      %47 = vector.shape_cast %46 : vector<1x8x128xf32> to vector<8x128xf32>
      %48 = vector.shape_cast %45 : vector<8x128xf32> to vector<1x8x128xf32>
      tpu.vector_store %arg5[%c0_21, %c0_22, %c0_23], %48 {strides = array<i32>} : memref<1x8x128xf32, #tpu.memory_space<vmem>>, vector<1x8x128xf32>,
      %c0_24 = arith.constant 0 : index
      %c0_25 = arith.constant 0 : index
      %c0_26 = arith.constant 0 : index
      %49 = vector.load %arg6[%c0_24, %c0_25, %c0_26] : memref<1x8x128xf32, #tpu.memory_space<vmem>>, vector<1x8x128xf32>
      %50 = vector.shape_cast %49 : vector<1x8x128xf32> to vector<8x128xf32>
      %51 = vector.shape_cast %31 : vector<16x128xf32> to vector<2x8x128xf32>
      %cst_27 = arith.constant dense<0.000000e+00> : vector<8x128xf32>
      %52 = vector.multi_reduction <add>, %51, %cst_27 [0] : vector<2x8x128xf32> to vector<8x128xf32>
      %53 = arith.addf %50, %52 : vector<8x128xf32>
      %c0_28 = arith.constant 0 : index
      %c0_29 = arith.constant 0 : index
      %c0_30 = arith.constant 0 : index
      %54 = vector.load %arg6[%c0_28, %c0_29, %c0_30] : memref<1x8x128xf32, #tpu.memory_space<vmem>>, vector<1x8x128xf32>
      %55 = vector.shape_cast %54 : vector<1x8x128xf32> to vector<8x128xf32>
      %56 = vector.shape_cast %53 : vector<8x128xf32> to vector<1x8x128xf32>
      tpu.vector_store %arg6[%c0_28, %c0_29, %c0_30], %56 {strides = array<i32>} : memref<1x8x128xf32, #tpu.memory_space<vmem>>, vector<1x8x128xf32>,
    } else {
    }
    return
  }
  func.func @transform_0(%arg0: i32, %arg1: i32) -> (i32, i32) {
    %c1_i32 = arith.constant 1 : i32
    %0 = arith.muli %arg0, %c1_i32 : i32
    %1 = arith.addi %0, %arg1 : i32
    %c0_i32 = arith.constant 0 : i32
    %2 = arith.minsi %1, %c0_i32 : i32
    %c0_i32_0 = arith.constant 0 : i32
    %c0_i32_1 = arith.constant 0 : i32
    return %2, %c0_i32_0 : i32, i32
  }
  func.func @transform_1(%arg0: i32, %arg1: i32) -> (i32, i32) {
    %c1_i32 = arith.constant 1 : i32
    %0 = arith.muli %arg0, %c1_i32 : i32
    %1 = arith.addi %0, %arg1 : i32
    %c0_i32 = arith.constant 0 : i32
    %2 = arith.minsi %1, %c0_i32 : i32
    %c0_i32_0 = arith.constant 0 : i32
    %c0_i32_1 = arith.constant 0 : i32
    return %2, %c0_i32_0 : i32, i32
  }
  func.func @transform_2(%arg0: i32, %arg1: i32) -> (i32, i32, i32) {
    %c0_i32 = arith.constant 0 : i32
    %c0_i32_0 = arith.constant 0 : i32
    %c0_i32_1 = arith.constant 0 : i32
    return %arg0, %c0_i32, %c0_i32_0 : i32, i32, i32
  }
  func.func @transform_3(%arg0: i32, %arg1: i32) -> (i32, i32, i32) {
    %c0_i32 = arith.constant 0 : i32
    %c0_i32_0 = arith.constant 0 : i32
    %c0_i32_1 = arith.constant 0 : i32
    return %arg0, %c0_i32, %c0_i32_0 : i32, i32, i32
  }
  func.func @transform_4(%arg0: i32, %arg1: i32) -> (i32, i32, i32) {
    %c0_i32 = arith.constant 0 : i32
    %c0_i32_0 = arith.constant 0 : i32
    %c0_i32_1 = arith.constant 0 : i32
    return %arg0, %c0_i32, %c0_i32_0 : i32, i32, i32
  }
}

</mosaic_0001>

<bundles_post_ra>
// kernel: tpu_custom_call.1
= control target key start
LH: loop header
LB: loop body
LE: loop exit
PB: predicated region body
PF: predicated region fallthrough
CT: control target
= control target key end

     0   :  { %10 = vsyncpa [#allocation3], 0  ;;  %s419_s0 = inlined_call_operand.hbm [shape: f32[16,128], index: 0, kind: input, shape index: {}]   ;;  %s420_s1 = inlined_call_operand.hbm [shape: f32[16,128], index: 1, kind: input, shape index: {}]   ;;  %s421_s2 = inlined_call_operand.hbm [shape: f32[1,8,128], index: 2, kind: output, shape index: {0}]   ;;  %s422_s3 = inlined_call_operand.hbm [shape: f32[1,8,128], index: 3, kind: output, shape index: {1}]   ;;  %s423_s4 = inlined_call_operand.hbm [shape: f32[1,8,128], index: 4, kind: output, shape index: {2}]  }
   0x1   :  { %11 = vsyncpa [#allocation6], 0 }
   0x2   :  { %12 = vsyncpa [#allocation4], 0 }
   0x3   :  { %13 = vsyncpa [#allocation9], 0  ;;  %s24_s17 = sshll.u32 %s419_s0, 4  ;;  %s372_s18 = smov [#allocation2]   ;;  %s25_s17 = int_to_ptr.hbm [resolvable:$true] %s24_s17 }
   0x4   :  { %s26_s19 = sshll.u32 %s372_s18, 4  ;;  %s43_s22 = sshll.u32 %s420_s1, 4  ;;  %s27_s19 = int_to_ptr.vmem [resolvable:$true] %s26_s19  ;;  %s44_s22 = int_to_ptr.hbm [resolvable:$true] %s43_s22 }
   0x5   :  { %s373_s23 = smov 128   ;;  %s374_s24 = smov 8  }
   0x6   :  { %32 = dma.hbm_to_vmem [thread:$0]  %s25_s17, 256, %s27_s19, [#allocation3], %s373_s23, %s373_s23, %s374_s24  }
   0x7   :  { %s375_s25 = smov [#allocation5]  }
   0x8   :  { %s45_s26 = sshll.u32 %s375_s25, 4  ;;  %s46_s26 = int_to_ptr.vmem [resolvable:$true] %s45_s26 }
   0x9   :  { %51 = dma.hbm_to_vmem [thread:$0]  %s44_s22, 256, %s46_s26, [#allocation6], %s373_s23, %s373_s23, %s374_s24  }
   0xa   :  { %364 = dma.done.wait [#allocation3], 256  }
   0xb   :  { %365 = vsyncadd [#allocation3], 4294967040 }
   0xc   :  { %366 = dma.done.wait [#allocation6], 256  }
   0xd   :  { %367 = vsyncadd [#allocation6], 4294967040  ;;  %v76_v0 = vld [vmem:[#allocation2] sm:$0xff]  ;;  %v77_v1 = vld [vmem:[#allocation2 + $0x8] sm:$0xff]  ;;  %s376_s0 = smov [#allocation8]   ;;  %s191_s29 = sshll.u32 %s422_s3, 4  ;;  %s192_s29 = int_to_ptr.hbm [resolvable:$true] %s191_s29 }
   0xe   :  { %v226_v2 = vmul.f32 -1.442695, %v76_v0  ;;  %v227_v3 = vmul.f32 -1.442695, %v77_v1  ;;  %v116_v4 = vld [vmem:[#allocation5] sm:$0xff]  ;;  %v117_v5 = vld [vmem:[#allocation5 + $0x8] sm:$0xff] }
   0xf   :  { %v133_v6 = vadd.f32 %v117_v5, %v116_v4  ;;  %s189_s1 = sshll.u32 %s376_s0, 4  ;;  %s377_s30 = smov [#allocation10]   ;;  %s190_s1 = int_to_ptr.vmem [resolvable:$true] %s189_s1 }
  0x10   :  { %236 = vpow2.f32 %v226_v2  ;;  %s200_s5 = sshll.u32 %s377_s30, 4  ;;  %s202_s8 = sshll.u32 %s423_s4, 4  ;;  %s201_s5 = int_to_ptr.vmem [resolvable:$true] %s200_s5  ;;  %s203_s8 = int_to_ptr.hbm [resolvable:$true] %s202_s8 }
  0x11   :  { %238 = vpow2.f32 %v227_v3  ;;  %135 = vst [vmem:[#allocation10] sm:$0xff] %v133_v6  ;;  %s378_s9 = smov [#allocation7]   ;;  %s180_s13 = sshll.u32 %s421_s2, 4  ;;  %s181_s13 = int_to_ptr.hbm [resolvable:$true] %s180_s13 }
  0x12   :  { %s178_s10 = sshll.u32 %s378_s9, 4  ;;  %s179_s10 = int_to_ptr.vmem [resolvable:$true] %s178_s10 }
  0x16   :  { %v237_v7 = vpop.eup %236 }
  0x17   :  { %v239_v8 = vpop.eup %238  ;;  %v84_v9 = vadd.f32 1.0, %v237_v7 }
  0x18   :  { %v85_v10 = vadd.f32 1.0, %v239_v8 }
  0x19   :  { %240 = vrcp.f32 %v84_v9  ;;  %vm91_vm0 = vweird.f32 %v84_v9  ;;  %v97_v14 = vand.u32 2147483648, %v84_v9  ;;  %v95_v17 = vand.u32 2147483647, %v84_v9 }
  0x1a   :  { %242 = vrcp.f32 %v85_v10  ;;  %v112_v18 = vand.u32 2147483648, %v85_v10  ;;  %vm106_vm2 = vweird.f32 %v85_v10  ;;  %v110_v20 = vand.u32 2147483647, %v85_v10 }
  0x1b   :  { %v98_v22 = vor.u32 1.1754944e-38, %v97_v14  ;;  %vm96_vm5 = vcmp.eq.f32.partialorder %v95_v17, 8.507059e+37 }
  0x1c   :  { %v113_v25 = vor.u32 1.1754944e-38, %v112_v18  ;;  %vm111_vm7 = vcmp.eq.f32.partialorder %v110_v20, 8.507059e+37 }
  0x1f   :  { %v241_v11 = vpop.eup %240 }
  0x20   :  { %v243_v12 = vpop.eup %242  ;;  %v87_v13 = vmul.f32 %v241_v11, %v84_v9  ;;  %vm92_vm1 = vweird.f32 %v241_v11 }
  0x21   :  { %v102_v15 = vmul.f32 %v243_v12, %v85_v10  ;;  %vm107_vm3 = vweird.f32 %v243_v12  ;;  %vm93_vm4 = vmor %vm91_vm0, %vm92_vm1 }
  0x22   :  { %v88_v16 = vsub.f32 1.0, %v87_v13  ;;  %vm108_vm6 = vmor %vm106_vm2, %vm107_vm3 }
  0x23   :  { %v103_v19 = vsub.f32 1.0, %v102_v15 }
  0x24   :  { %v89_v21 = vmul.f32 %v241_v11, %v88_v16 }
  0x25   :  { %v104_v23 = vmul.f32 %v243_v12, %v103_v19 }
  0x26   :  { %v90_v24 = vadd.f32 %v241_v11, %v89_v21 }
  0x27   :  { %v105_v26 = vadd.f32 %v243_v12, %v104_v23 }
  0x28   :  { %v94_v27 = vsel %vm93_vm4, %v241_v11, %v90_v24 }
  0x29   :  { %v99_v28 = vsel %vm96_vm5, %v98_v22, %v94_v27  ;;  %v109_v29 = vsel %vm108_vm6, %v243_v12, %v105_v26 }
  0x2a   :  { %v114_v30 = vsel %vm111_vm7, %v113_v25, %v109_v29  ;;  %v123_v31 = vmul.f32 %v116_v4, %v99_v28 }
  0x2b   :  { %v129_v32 = vadd.f32 %v114_v30, %v99_v28  ;;  %v124_v33 = vmul.f32 %v117_v5, %v114_v30 }
  0x2d   :  { %v125_v34 = vadd.f32 %v124_v33, %v123_v31  ;;  %131 = vst [vmem:[#allocation8] sm:$0xff] %v129_v32 }
  0x2e   :  { %194 = dma.vmem_to_hbm [thread:$0]  %s190_s1, 128, %s192_s29, [#allocation9]  }
  0x2f   :  { %127 = vst [vmem:[#allocation7] sm:$0xff] %v125_v34  ;;  %205 = dma.vmem_to_hbm [thread:$0]  %s201_s5, 128, %s203_s8, [#allocation9]  }
  0x30   :  { %183 = dma.vmem_to_hbm [thread:$0]  %s179_s10, 128, %s181_s13, [#allocation4]  }
  0x31   :  { %368 = dma.done.wait [#allocation4], 128  }
  0x32   :  { %369 = vsyncadd [#allocation4], 4294967168 }
  0x33   :  { %370 = dma.done.wait [#allocation9], 256  }
  0x34   :  { %371 = vsyncadd [#allocation9], 4294967040 }
  0x35   :  { %218 = vsyncpa [#allocation3], 1 }
  0x36   :  { %219 = vsyncpa [#allocation6], 1 }
  0x37   :  { %220 = vsyncpa [#allocation4], 1 }
  0x38   :  { %221 = vsyncpa [#allocation9], 1 }

</bundles_post_ra>
